<compile_context>
chip_gen: v7x
topology: tpu7x:2x2x1
jax: 0.10.0
libtpu: 0.0.40
codegen_flags: <defaults>
</compile_context>

<pallas_src>
import functools

import jax
import jax.numpy as jnp
from jax.experimental import pallas as pl
from jax.experimental.pallas import tpu as pltpu


# --------------------------------------------------------------------------
# Kernel
# --------------------------------------------------------------------------
def _dice_partial_kernel(p_ref, t_ref, num_ref, den_ref, *,
                         power, f_valid, rt, row_chunk, lanes,
                         tiles_per_chunk, unroll, binary_targets):
    c = pl.program_id(1)
    j = pl.program_id(2)

    @pl.when(j == 0)
    def _():
        num_ref[...] = jnp.zeros_like(num_ref)
        den_ref[...] = jnp.zeros_like(den_ref)

    tile_row0 = (c * tiles_per_chunk + j) * rt          # global first row of tile
    num_row_chunks = rt // row_chunk

    def contrib(pred, targ):
        num_c = pred * targ
        if power == 2:                                   # VALU-only path
            tt = targ if binary_targets else targ * targ
            den_c = pred * pred + tt
        elif power == 1:
            den_c = pred + targ
        else:                                            # generic (float p allowed)
            den_c = pred ** power + targ ** power
        return num_c, den_c

    def run(masked):
        if masked:
            row_iota = jax.lax.broadcasted_iota(jnp.int32, (row_chunk, lanes), 0)
            lane_iota = jax.lax.broadcasted_iota(jnp.int32, (row_chunk, lanes), 1)

        def body(r, carry):
            num_acc, den_acc = carry
            off = pl.multiple_of(r * row_chunk, row_chunk)
            x = p_ref[pl.ds(off, row_chunk), :].astype(jnp.float32)
            # sigmoid(x) == 0.5*tanh(0.5*x)+0.5 : one EUP op, no divide.
            pred = 0.5 * jnp.tanh(0.5 * x) + 0.5
            targ = t_ref[pl.ds(off, row_chunk), :].astype(jnp.float32)
            num_c, den_c = contrib(pred, targ)
            if masked:
                flat = (tile_row0 + off + row_iota) * lanes + lane_iota
                valid = flat < f_valid
                num_c = jnp.where(valid, num_c, 0.0)
                den_c = jnp.where(valid, den_c, 0.0)
            return num_acc + num_c, den_acc + den_c

        init = (jnp.zeros((row_chunk, lanes), jnp.float32),
                jnp.zeros((row_chunk, lanes), jnp.float32))
        num_acc, den_acc = jax.lax.fori_loop(0, num_row_chunks, body, init,
                                             unroll=unroll)
        num_ref[...] += num_acc
        den_ref[...] += den_acc

    # Does this tile extend past the valid flat extent of the sample?
    is_partial = (tile_row0 + rt) * lanes > f_valid

    @pl.when(jnp.logical_not(is_partial))
    def _():
        run(False)

    @pl.when(is_partial)
    def _():
        run(True)


# --------------------------------------------------------------------------
# Wrapper
# --------------------------------------------------------------------------
def _round_up(x, m):
    return ((x + m - 1) // m) * m


def _vmem_capacity_bytes():
    try:
        cap = getattr(pltpu.get_tpu_info(), "vmem_capacity_bytes", None)
        if cap:
            return int(cap)
    except Exception:
        pass
    return 64 * 1024 * 1024  # conservative: v7x per-core physical VMEM


def _num_tensorcores():
    try:
        info = pltpu.get_tpu_info()
        for attr in ("num_cores", "core_count", "num_tensorcores", "tensor_core_count"):
            v = getattr(info, attr, None)
            if v:
                return int(v)
    except Exception:
        pass
    try:
        v = getattr(jax.devices()[0], "num_cores", None)
        if v:
            return int(v)
    except Exception:
        pass
    return 1


def binary_dice_loss_logits(predict, target, *, smooth=1.0, p=2, reduction="mean",
                            assume_binary_targets=False):
    assert predict.shape[0] == target.shape[0], "predict & target batch size don't match"
    n = predict.shape[0]
    f = 1
    for d in predict.shape[1:]:
        f *= d

    predict2 = predict.reshape(n, f)
    target2 = target.reshape(n, f)

    p_item = jnp.dtype(predict2.dtype).itemsize
    t_item = jnp.dtype(target2.dtype).itemsize
    max_item = max(p_item, t_item)
    min_item = min(p_item, t_item)

    # Sublane packing of the narrowest streamed dtype: 8 (4B) / 16 (2B) / 32 (1B).
    row_chunk = max(8, 32 // min_item)
    # Keep each f32 accumulator at <= 4 vregs (row_chunk*lanes <= 4096).
    pref_lanes = max(128, min(512, 4096 // row_chunk))

    # ---- lane width + (rare) minimal padding --------------------------------
    if f % 128 == 0:
        lanes = pref_lanes
        while f % lanes != 0:
            lanes //= 2
        f_pad = f                                  # free reshape, no copy
    else:
        lanes = 128 if f < pref_lanes else pref_lanes
        f_pad = _round_up(f, lanes)
        # TODO(synk): a fully pad-free path for f % 128 != 0 would need an
        # element-strided manual DMA; the copy below is only ~1x extra traffic.

    if f_pad != f:
        # Zero padding; pad value is irrelevant (padded positions are masked
        # out inside the kernel), so this is safe for every input dtype.
        predict2 = jnp.pad(predict2, ((0, 0), (0, f_pad - f)))
        target2 = jnp.pad(target2, ((0, 0), (0, f_pad - f)))

    rows = f_pad // lanes
    predict3 = predict2.reshape(n, rows, lanes)
    target3 = target2.reshape(n, rows, lanes)

    # ---- generation-aware VMEM budget ---------------------------------------
    vmem_cap = _vmem_capacity_bytes()
    if vmem_cap <= 64 * 1024 * 1024:               # v7x-class: 64 MiB per TC
        vmem_limit = min((vmem_cap * 3) // 4, 48 * 1024 * 1024)
        block_bytes = min(5 * 1024 * 1024, vmem_limit // 8)
    else:                                          # v5e / v6e: 128 MiB per TC
        vmem_limit = min((vmem_cap * 3) // 4, 100 * 1024 * 1024)
        block_bytes = vmem_limit // 8              # ~12 MiB per input per buffer

    # ---- rows per block ------------------------------------------------------
    if rows <= row_chunk:
        rt = rows
        row_chunk_eff = rows
        nb = 1
    else:
        rt_budget = max(row_chunk,
                        (block_bytes // (lanes * max_item)) // row_chunk * row_chunk)
        rt = min(rt_budget, _round_up(rows, row_chunk))
        row_chunk_eff = row_chunk
        nb = -(-rows // rt)

    # ---- megacore feature split: only when the batch can't feed all TCs -----
    cores = _num_tensorcores()
    chunks = 2 if (cores >= 2 and n < cores and nb >= 2) else 1
    if chunks > 1:
        nb = _round_up(nb, chunks)
    tiles_per_chunk = nb // chunks

    p_float = float(p)
    power = int(p_float) if p_float == int(p_float) else p_float

    num_row_chunks = rt // row_chunk_eff
    kernel = functools.partial(
        _dice_partial_kernel,
        power=power,
        f_valid=f,
        rt=rt,
        row_chunk=row_chunk_eff,
        lanes=lanes,
        tiles_per_chunk=tiles_per_chunk,
        unroll=min(4, max(1, num_row_chunks)),
        binary_targets=bool(assume_binary_targets),
    )

    num_part, den_part = pl.pallas_call(
        kernel,
        out_shape=(
            jax.ShapeDtypeStruct((n, chunks, row_chunk_eff, lanes), jnp.float32),
            jax.ShapeDtypeStruct((n, chunks, row_chunk_eff, lanes), jnp.float32),
        ),
        grid=(n, chunks, tiles_per_chunk),
        in_specs=[
            pl.BlockSpec((None, rt, lanes),
                         lambda i, c, j: (i, c * tiles_per_chunk + j, 0)),
            pl.BlockSpec((None, rt, lanes),
                         lambda i, c, j: (i, c * tiles_per_chunk + j, 0)),
        ],
        out_specs=(
            pl.BlockSpec((None, None, row_chunk_eff, lanes),
                         lambda i, c, j: (i, c, 0, 0)),
            pl.BlockSpec((None, None, row_chunk_eff, lanes),
                         lambda i, c, j: (i, c, 0, 0)),
        ),
        compiler_params=pltpu.CompilerParams(
            dimension_semantics=("parallel", "parallel", "arbitrary"),
            vmem_limit_bytes=int(vmem_limit),
        ),
    )(predict3, target3)

    # Final tiny reduction in plain JAX (supports all three reductions).
    smooth_f = jnp.float32(smooth)
    num = jnp.sum(num_part, axis=(1, 2, 3)) + smooth_f   # (n,)
    den = jnp.sum(den_part, axis=(1, 2, 3)) + smooth_f   # (n,)
    loss = 1.0 - num / den

    if reduction == "mean":
        return jnp.mean(loss)
    elif reduction == "sum":
        return jnp.sum(loss)
    elif reduction == "none":
        return loss
    else:
        raise Exception("Unexpected reduction {}".format(reduction))


# --------------------------------------------------------------------------
# Reference & tests
# --------------------------------------------------------------------------
def _reference(predict, target, smooth=1.0, p=2, reduction="mean"):
    n = predict.shape[0]
    pr = jax.nn.sigmoid(predict.astype(jnp.float32)).reshape(n, -1)
    tg = target.astype(jnp.float32).reshape(n, -1)
    num = jnp.sum(pr * tg, axis=1) + smooth
    den = jnp.sum(pr ** p + tg ** p, axis=1) + smooth
    loss = 1.0 - num / den
    if reduction == "mean":
        return jnp.mean(loss)
    if reduction == "sum":
        return jnp.sum(loss)
    return loss


if __name__ == "__main__":
    key = jax.random.PRNGKey(0)
    k1, k2, k3, k4, k5, k6 = jax.random.split(key, 6)

    # Case 1: NCHW logits, lane-aligned features (4*16*16 = 1024), f32, no pad.
    predict = jax.random.normal(k1, (2, 4, 16, 16), dtype=jnp.float32)
    target = (jax.random.uniform(k2, (2, 4, 16, 16)) > 0.5).astype(jnp.float32)
    loss = jax.block_until_ready(
        binary_dice_loss_logits(predict, target, smooth=1.0, p=2, reduction="mean"))
    ref = _reference(predict, target)
    assert jnp.allclose(loss, ref, atol=1e-5, rtol=1e-4), (loss, ref)

    loss_none = jax.block_until_ready(
        binary_dice_loss_logits(predict, target, reduction="none"))
    ref_none = _reference(predict, target, reduction="none")
    assert jnp.allclose(loss_none, ref_none, atol=1e-5, rtol=1e-4), (loss_none, ref_none)

    # Case 2: non-128-aligned features (3*7*7 = 147) -> exercises in-kernel mask.
    predict2 = jax.random.normal(k3, (2, 3, 7, 7), dtype=jnp.float32)
    target2 = (jax.random.uniform(k4, (2, 3, 7, 7)) > 0.5).astype(jnp.float32)
    loss2 = jax.block_until_ready(
        binary_dice_loss_logits(predict2, target2, reduction="sum"))
    ref2 = _reference(predict2, target2, reduction="sum")
    assert jnp.allclose(loss2, ref2, atol=1e-5, rtol=1e-4), (loss2, ref2)

    # Case 3: bf16 logits (8*32*32 = 8192) -> exercises packed-dtype row_chunk path.
    predict3 = jax.random.normal(k5, (2, 8, 32, 32), dtype=jnp.float32).astype(jnp.bfloat16)
    target3 = (jax.random.uniform(k6, (2, 8, 32, 32)) > 0.5).astype(jnp.float32)
    loss3 = jax.block_until_ready(
        binary_dice_loss_logits(predict3, target3, reduction="mean"))
    ref3 = _reference(predict3, target3)
    assert jnp.allclose(loss3, ref3, atol=1e-4, rtol=1e-3), (loss3, ref3)

    print("KERNEL_OK")
</pallas_src>

<mosaic_0001>
module attributes {stable_mosaic.version = 11 : i64} {
  func.func @_dice_partial_kernel(%arg0: i32, %arg1: i32, %arg2: i32, %arg3: memref<1x2x512xf32, #tpu.memory_space<vmem>>, %arg4: memref<1x2x512xf32, #tpu.memory_space<vmem>>, %arg5: memref<1x1x2x512xf32, #tpu.memory_space<vmem>>, %arg6: memref<1x1x2x512xf32, #tpu.memory_space<vmem>>) attributes {dimension_semantics = [#tpu.dimension_semantics<parallel>, #tpu.dimension_semantics<parallel>, #tpu.dimension_semantics<arbitrary>], iteration_bounds = array<i64: 2, 1, 1>, scalar_prefetch = 0 : i64, scratch_operands = 0 : i64, tpu.core_type = #tpu.core_type<tc>, window_params = [{transform_indices = @transform_0, window_bounds = array<i64: 1, 2, 512>}, {transform_indices = @transform_1, window_bounds = array<i64: 1, 2, 512>}, {transform_indices = @transform_2, window_bounds = array<i64: 1, 1, 2, 512>}, {transform_indices = @transform_3, window_bounds = array<i64: 1, 1, 2, 512>}]} {
    %c0_i32 = arith.constant 0 : i32
    %0 = arith.cmpi eq, %arg2, %c0_i32 : i32
    %1 = arith.extui %0 : i1 to i32
    %c0_i32_0 = arith.constant 0 : i32
    %2 = arith.cmpi ne, %1, %c0_i32_0 : i32
    scf.if %2 {
      %cst = arith.constant 0.000000e+00 : f32
      %14 = vector.broadcast %cst : f32 to vector<2x512xf32>
      %c0 = arith.constant 0 : index
      %c0_4 = arith.constant 0 : index
      %c0_5 = arith.constant 0 : index
      %c0_6 = arith.constant 0 : index
      %15 = vector.load %arg5[%c0, %c0_4, %c0_5, %c0_6] : memref<1x1x2x512xf32, #tpu.memory_space<vmem>>, vector<1x1x2x512xf32>
      %16 = vector.shape_cast %15 : vector<1x1x2x512xf32> to vector<2x512xf32>
      %17 = vector.shape_cast %14 : vector<2x512xf32> to vector<1x1x2x512xf32>
      tpu.vector_store %arg5[%c0, %c0_4, %c0_5, %c0_6], %17 {strides = array<i32>} : memref<1x1x2x512xf32, #tpu.memory_space<vmem>>, vector<1x1x2x512xf32>,
      %cst_7 = arith.constant 0.000000e+00 : f32
      %18 = vector.broadcast %cst_7 : f32 to vector<2x512xf32>
      %c0_8 = arith.constant 0 : index
      %c0_9 = arith.constant 0 : index
      %c0_10 = arith.constant 0 : index
      %c0_11 = arith.constant 0 : index
      %19 = vector.load %arg6[%c0_8, %c0_9, %c0_10, %c0_11] : memref<1x1x2x512xf32, #tpu.memory_space<vmem>>, vector<1x1x2x512xf32>
      %20 = vector.shape_cast %19 : vector<1x1x2x512xf32> to vector<2x512xf32>
      %21 = vector.shape_cast %18 : vector<2x512xf32> to vector<1x1x2x512xf32>
      tpu.vector_store %arg6[%c0_8, %c0_9, %c0_10, %c0_11], %21 {strides = array<i32>} : memref<1x1x2x512xf32, #tpu.memory_space<vmem>>, vector<1x1x2x512xf32>,
    } else {
    }
    %c1_i32 = arith.constant 1 : i32
    %3 = arith.muli %arg1, %c1_i32 : i32
    %4 = arith.addi %3, %arg2 : i32
    %c2_i32 = arith.constant 2 : i32
    %5 = arith.muli %4, %c2_i32 : i32
    %c2_i32_1 = arith.constant 2 : i32
    %6 = arith.addi %5, %c2_i32_1 : i32
    %c512_i32 = arith.constant 512 : i32
    %7 = arith.muli %6, %c512_i32 : i32
    %c1024_i32 = arith.constant 1024 : i32
    %8 = arith.cmpi sgt, %7, %c1024_i32 : i32
    %true = arith.constant true
    %9 = arith.xori %8, %true : i1
    %10 = arith.extui %9 : i1 to i32
    %c0_i32_2 = arith.constant 0 : i32
    %11 = arith.cmpi ne, %10, %c0_i32_2 : i32
    scf.if %11 {
      %cst = arith.constant 0.000000e+00 : f32
      %14 = vector.broadcast %cst : f32 to vector<2x512xf32>
      %cst_4 = arith.constant 0.000000e+00 : f32
      %15 = vector.broadcast %cst_4 : f32 to vector<2x512xf32>
      %c0_i32_5 = arith.constant 0 : i32
      %c2_i32_6 = arith.constant 2 : i32
      %16 = arith.muli %c0_i32_5, %c2_i32_6 : i32
      %17 = tpu.assume_multiple %16, 2 : i32
      %c0 = arith.constant 0 : index
      %18 = arith.index_cast %17 : i32 to index
      %c0_7 = arith.constant 0 : index
      %19 = vector.load %arg3[%c0, %18, %c0_7] : memref<1x2x512xf32, #tpu.memory_space<vmem>>, vector<1x2x512xf32>
      %20 = vector.shape_cast %19 : vector<1x2x512xf32> to vector<2x512xf32>
      %cst_8 = arith.constant 5.000000e-01 : f32
      %21 = vector.broadcast %cst_8 : f32 to vector<2x512xf32>
      %22 = arith.mulf %21, %20 : vector<2x512xf32>
      %23 = math.tanh %22 : vector<2x512xf32>
      %cst_9 = arith.constant 5.000000e-01 : f32
      %24 = vector.broadcast %cst_9 : f32 to vector<2x512xf32>
      %25 = arith.mulf %24, %23 : vector<2x512xf32>
      %cst_10 = arith.constant 5.000000e-01 : f32
      %26 = vector.broadcast %cst_10 : f32 to vector<2x512xf32>
      %27 = arith.addf %25, %26 : vector<2x512xf32>
      %c0_11 = arith.constant 0 : index
      %28 = arith.index_cast %17 : i32 to index
      %c0_12 = arith.constant 0 : index
      %29 = vector.load %arg4[%c0_11, %28, %c0_12] : memref<1x2x512xf32, #tpu.memory_space<vmem>>, vector<1x2x512xf32>
      %30 = vector.shape_cast %29 : vector<1x2x512xf32> to vector<2x512xf32>
      %31 = arith.mulf %27, %30 : vector<2x512xf32>
      %32 = arith.mulf %30, %30 : vector<2x512xf32>
      %33 = arith.mulf %27, %27 : vector<2x512xf32>
      %34 = arith.addf %33, %32 : vector<2x512xf32>
      %35 = arith.addf %14, %31 : vector<2x512xf32>
      %36 = arith.addf %15, %34 : vector<2x512xf32>
      %c1_i32_13 = arith.constant 1 : i32
      %c0_14 = arith.constant 0 : index
      %c0_15 = arith.constant 0 : index
      %c0_16 = arith.constant 0 : index
      %c0_17 = arith.constant 0 : index
      %37 = vector.load %arg5[%c0_14, %c0_15, %c0_16, %c0_17] : memref<1x1x2x512xf32, #tpu.memory_space<vmem>>, vector<1x1x2x512xf32>
      %38 = vector.shape_cast %37 : vector<1x1x2x512xf32> to vector<2x512xf32>
      %39 = arith.addf %38, %35 : vector<2x512xf32>
      %c0_18 = arith.constant 0 : index
      %c0_19 = arith.constant 0 : index
      %c0_20 = arith.constant 0 : index
      %c0_21 = arith.constant 0 : index
      %40 = vector.load %arg5[%c0_18, %c0_19, %c0_20, %c0_21] : memref<1x1x2x512xf32, #tpu.memory_space<vmem>>, vector<1x1x2x512xf32>
      %41 = vector.shape_cast %40 : vector<1x1x2x512xf32> to vector<2x512xf32>
      %42 = vector.shape_cast %39 : vector<2x512xf32> to vector<1x1x2x512xf32>
      tpu.vector_store %arg5[%c0_18, %c0_19, %c0_20, %c0_21], %42 {strides = array<i32>} : memref<1x1x2x512xf32, #tpu.memory_space<vmem>>, vector<1x1x2x512xf32>,
      %c0_22 = arith.constant 0 : index
      %c0_23 = arith.constant 0 : index
      %c0_24 = arith.constant 0 : index
      %c0_25 = arith.constant 0 : index
      %43 = vector.load %arg6[%c0_22, %c0_23, %c0_24, %c0_25] : memref<1x1x2x512xf32, #tpu.memory_space<vmem>>, vector<1x1x2x512xf32>
      %44 = vector.shape_cast %43 : vector<1x1x2x512xf32> to vector<2x512xf32>
      %45 = arith.addf %44, %36 : vector<2x512xf32>
      %c0_26 = arith.constant 0 : index
      %c0_27 = arith.constant 0 : index
      %c0_28 = arith.constant 0 : index
      %c0_29 = arith.constant 0 : index
      %46 = vector.load %arg6[%c0_26, %c0_27, %c0_28, %c0_29] : memref<1x1x2x512xf32, #tpu.memory_space<vmem>>, vector<1x1x2x512xf32>
      %47 = vector.shape_cast %46 : vector<1x1x2x512xf32> to vector<2x512xf32>
      %48 = vector.shape_cast %45 : vector<2x512xf32> to vector<1x1x2x512xf32>
      tpu.vector_store %arg6[%c0_26, %c0_27, %c0_28, %c0_29], %48 {strides = array<i32>} : memref<1x1x2x512xf32, #tpu.memory_space<vmem>>, vector<1x1x2x512xf32>,
    } else {
    }
    %12 = arith.extui %8 : i1 to i32
    %c0_i32_3 = arith.constant 0 : i32
    %13 = arith.cmpi ne, %12, %c0_i32_3 : i32
    scf.if %13 {
      %14 = tpu.iota {dimensions = array<i32: 0>} : vector<2x512xi32>
      %15 = tpu.iota {dimensions = array<i32: 1>} : vector<2x512xi32>
      %cst = arith.constant 0.000000e+00 : f32
      %16 = vector.broadcast %cst : f32 to vector<2x512xf32>
      %cst_4 = arith.constant 0.000000e+00 : f32
      %17 = vector.broadcast %cst_4 : f32 to vector<2x512xf32>
      %c0_i32_5 = arith.constant 0 : i32
      %c2_i32_6 = arith.constant 2 : i32
      %18 = arith.muli %c0_i32_5, %c2_i32_6 : i32
      %19 = tpu.assume_multiple %18, 2 : i32
      %c0 = arith.constant 0 : index
      %20 = arith.index_cast %19 : i32 to index
      %c0_7 = arith.constant 0 : index
      %21 = vector.load %arg3[%c0, %20, %c0_7] : memref<1x2x512xf32, #tpu.memory_space<vmem>>, vector<1x2x512xf32>
      %22 = vector.shape_cast %21 : vector<1x2x512xf32> to vector<2x512xf32>
      %cst_8 = arith.constant 5.000000e-01 : f32
      %23 = vector.broadcast %cst_8 : f32 to vector<2x512xf32>
      %24 = arith.mulf %23, %22 : vector<2x512xf32>
      %25 = math.tanh %24 : vector<2x512xf32>
      %cst_9 = arith.constant 5.000000e-01 : f32
      %26 = vector.broadcast %cst_9 : f32 to vector<2x512xf32>
      %27 = arith.mulf %26, %25 : vector<2x512xf32>
      %cst_10 = arith.constant 5.000000e-01 : f32
      %28 = vector.broadcast %cst_10 : f32 to vector<2x512xf32>
      %29 = arith.addf %27, %28 : vector<2x512xf32>
      %c0_11 = arith.constant 0 : index
      %30 = arith.index_cast %19 : i32 to index
      %c0_12 = arith.constant 0 : index
      %31 = vector.load %arg4[%c0_11, %30, %c0_12] : memref<1x2x512xf32, #tpu.memory_space<vmem>>, vector<1x2x512xf32>
      %32 = vector.shape_cast %31 : vector<1x2x512xf32> to vector<2x512xf32>
      %33 = arith.mulf %29, %32 : vector<2x512xf32>
      %34 = arith.mulf %32, %32 : vector<2x512xf32>
      %35 = arith.mulf %29, %29 : vector<2x512xf32>
      %36 = arith.addf %35, %34 : vector<2x512xf32>
      %37 = arith.addi %5, %19 : i32
      %38 = vector.broadcast %37 : i32 to vector<2x512xi32>
      %39 = arith.addi %38, %14 : vector<2x512xi32>
      %c512_i32_13 = arith.constant 512 : i32
      %40 = vector.broadcast %c512_i32_13 : i32 to vector<2x512xi32>
      %41 = arith.muli %39, %40 : vector<2x512xi32>
      %42 = arith.addi %41, %15 : vector<2x512xi32>
      %c1024_i32_14 = arith.constant 1024 : i32
      %43 = vector.broadcast %c1024_i32_14 : i32 to vector<2x512xi32>
      %44 = arith.cmpi slt, %42, %43 : vector<2x512xi32>
      %cst_15 = arith.constant 0.000000e+00 : f32
      %45 = vector.broadcast %cst_15 : f32 to vector<2x512xf32>
      %46 = arith.select %44, %33, %45 : vector<2x512xi1>, vector<2x512xf32>
      %cst_16 = arith.constant 0.000000e+00 : f32
      %47 = vector.broadcast %cst_16 : f32 to vector<2x512xf32>
      %48 = arith.select %44, %36, %47 : vector<2x512xi1>, vector<2x512xf32>
      %49 = arith.addf %16, %46 : vector<2x512xf32>
      %50 = arith.addf %17, %48 : vector<2x512xf32>
      %c1_i32_17 = arith.constant 1 : i32
      %c0_18 = arith.constant 0 : index
      %c0_19 = arith.constant 0 : index
      %c0_20 = arith.constant 0 : index
      %c0_21 = arith.constant 0 : index
      %51 = vector.load %arg5[%c0_18, %c0_19, %c0_20, %c0_21] : memref<1x1x2x512xf32, #tpu.memory_space<vmem>>, vector<1x1x2x512xf32>
      %52 = vector.shape_cast %51 : vector<1x1x2x512xf32> to vector<2x512xf32>
      %53 = arith.addf %52, %49 : vector<2x512xf32>
      %c0_22 = arith.constant 0 : index
      %c0_23 = arith.constant 0 : index
      %c0_24 = arith.constant 0 : index
      %c0_25 = arith.constant 0 : index
      %54 = vector.load %arg5[%c0_22, %c0_23, %c0_24, %c0_25] : memref<1x1x2x512xf32, #tpu.memory_space<vmem>>, vector<1x1x2x512xf32>
      %55 = vector.shape_cast %54 : vector<1x1x2x512xf32> to vector<2x512xf32>
      %56 = vector.shape_cast %53 : vector<2x512xf32> to vector<1x1x2x512xf32>
      tpu.vector_store %arg5[%c0_22, %c0_23, %c0_24, %c0_25], %56 {strides = array<i32>} : memref<1x1x2x512xf32, #tpu.memory_space<vmem>>, vector<1x1x2x512xf32>,
      %c0_26 = arith.constant 0 : index
      %c0_27 = arith.constant 0 : index
      %c0_28 = arith.constant 0 : index
      %c0_29 = arith.constant 0 : index
      %57 = vector.load %arg6[%c0_26, %c0_27, %c0_28, %c0_29] : memref<1x1x2x512xf32, #tpu.memory_space<vmem>>, vector<1x1x2x512xf32>
      %58 = vector.shape_cast %57 : vector<1x1x2x512xf32> to vector<2x512xf32>
      %59 = arith.addf %58, %50 : vector<2x512xf32>
      %c0_30 = arith.constant 0 : index
      %c0_31 = arith.constant 0 : index
      %c0_32 = arith.constant 0 : index
      %c0_33 = arith.constant 0 : index
      %60 = vector.load %arg6[%c0_30, %c0_31, %c0_32, %c0_33] : memref<1x1x2x512xf32, #tpu.memory_space<vmem>>, vector<1x1x2x512xf32>
      %61 = vector.shape_cast %60 : vector<1x1x2x512xf32> to vector<2x512xf32>
      %62 = vector.shape_cast %59 : vector<2x512xf32> to vector<1x1x2x512xf32>
      tpu.vector_store %arg6[%c0_30, %c0_31, %c0_32, %c0_33], %62 {strides = array<i32>} : memref<1x1x2x512xf32, #tpu.memory_space<vmem>>, vector<1x1x2x512xf32>,
    } else {
    }
    return
  }
  func.func @transform_0(%arg0: i32, %arg1: i32, %arg2: i32) -> (i32, i32, i32) {
    %c1_i32 = arith.constant 1 : i32
    %0 = arith.muli %arg1, %c1_i32 : i32
    %1 = arith.addi %0, %arg2 : i32
    %c0_i32 = arith.constant 0 : i32
    %c0_i32_0 = arith.constant 0 : i32
    return %arg0, %1, %c0_i32 : i32, i32, i32
  }
  func.func @transform_1(%arg0: i32, %arg1: i32, %arg2: i32) -> (i32, i32, i32) {
    %c1_i32 = arith.constant 1 : i32
    %0 = arith.muli %arg1, %c1_i32 : i32
    %1 = arith.addi %0, %arg2 : i32
    %c0_i32 = arith.constant 0 : i32
    %c0_i32_0 = arith.constant 0 : i32
    return %arg0, %1, %c0_i32 : i32, i32, i32
  }
  func.func @transform_2(%arg0: i32, %arg1: i32, %arg2: i32) -> (i32, i32, i32, i32) {
    %c0_i32 = arith.constant 0 : i32
    %c0_i32_0 = arith.constant 0 : i32
    %c0_i32_1 = arith.constant 0 : i32
    return %arg0, %arg1, %c0_i32, %c0_i32_0 : i32, i32, i32, i32
  }
  func.func @transform_3(%arg0: i32, %arg1: i32, %arg2: i32) -> (i32, i32, i32, i32) {
    %c0_i32 = arith.constant 0 : i32
    %c0_i32_0 = arith.constant 0 : i32
    %c0_i32_1 = arith.constant 0 : i32
    return %arg0, %arg1, %c0_i32, %c0_i32_0 : i32, i32, i32, i32
  }
}

</mosaic_0001>

<bundles_post_ra>
// kernel: tpu_custom_call.1
= control target key start
LH: loop header
LB: loop body
LE: loop exit
PB: predicated region body
PF: predicated region fallthrough
CT: control target
= control target key end

     0   :  { %9 = vsyncpa [#allocation3], 0  ;;  %s1213_s0 = inlined_call_operand.hbm [shape: f32[2,2,512], index: 0, kind: input, shape index: {}]   ;;  %s1214_s1 = inlined_call_operand.hbm [shape: f32[2,2,512], index: 1, kind: input, shape index: {}]   ;;  %s1215_s2 = inlined_call_operand.hbm [shape: f32[2,1,2,512], index: 2, kind: output, shape index: {0}]   ;;  %s1216_s3 = inlined_call_operand.hbm [shape: f32[2,1,2,512], index: 3, kind: output, shape index: {1}]  }
   0x1   :  { %11 = vsyncpa [#allocation3 + $0x1], 0 }
   0x2   :  { %12 = vsyncpa [#allocation6], 0 }
   0x3   :  { %14 = vsyncpa [#allocation6 + $0x1], 0 }
   0x4   :  { %15 = vsyncpa [#allocation4], 0 }
   0x5   :  { %17 = vsyncpa [#allocation4 + $0x1], 0 }
   0x6   :  { %18 = vsyncpa [#allocation9], 0 }
   0x7   :  { %20 = vsyncpa [#allocation9 + $0x1], 0  ;;  %s954_s12 = smov 0   ;;  %s956_s13 = smov 0  }
   0x8   :  { %s958_s14 = smov 0   ;;  %s960_s15 = smov 0  }
   0x9   :  { %s962_s16 = smov 0   ;;  %s964_s17 = smov 0  }
   0xa LB: > { %s648_s18 = sadd.s32 4294967295, %s928_s17   ;;  %s649_s19 = sadd.s32 4294967294, %s928_s17   ;;  %s928_s17 = sphi %s964_s17, %s26_s17   ;;  %s924_s16 = sphi %s962_s16, %s1236_s16   ;;  %s920_s15 = sphi %s960_s15, %s1235_s15   ;;  %s916_s14 = sphi %s958_s14, %s1234_s14   ;;  %s912_s13 = sphi %s956_s13, %s1233_s13   ;;  %s908_s12 = sphi %s954_s12, %s1232_s12  }
   0xb   : > { %s45_s20 = sadd.s32 1, %s924_s16  ;;  %s56_s21 = sadd.s32 1, %s916_s14 }
   0xc   : > { %p47_p0 = scmp.ge.s32.totalorder %s45_s20, 2  ;;  %p63_p1 = scmp.ne.s32.totalorder %s916_s14, %s912_s13 }
   0xd   : > { %p64_p2 = scmp.eq.s32.totalorder %s928_s17, 0  ;;  %p69_p3 = scmp.ne.s32.totalorder %s912_s13, %s908_s12 }
   0xe   : > { %s1238_s20 = smov (%p47_p0, %s45_s20), 0  ;;  %p70_p5 = scmp.eq.s32.totalorder %s648_s18, 0 }
   0xf   : > { %p995_p4 = por %p64_p2, %p63_p1  ;;  %s51_s23 = ssub.s32 %s924_s16, %s1238_s20 }
  0x10   : > { %p125_p6 = scmp.eq.s32.totalorder %s648_s18, 1  ;;  %p54_p7 = scmp.eq.s32.totalorder %s51_s23, 0 }
  0x11   : > { %p1001_p8 = por %p70_p5, %p69_p3  ;;  %p131_p10 = scmp.eq.s32.totalorder %s649_s19, 1 }
  0x12   : > { %p1005_p9 = por %p125_p6, %p63_p1  ;;  %p697_p13 = scmp.lt.s32.totalorder %s928_s17, 2 }
  0x13   : > { %s1220_s24 = scalar_select %p1001_p8, 1, 0 }
  0x14   : > { %s1221_s25 = scalar_select %p1005_p9, 1, 0 }
  0x15   : > { %s1010_s26 = scalar_select %p54_p7, %s916_s14, %s56_s21  }
  0x16   : > { %p1012_p11 = por %p131_p10, %p69_p3  ;;  %s1019_s28 = sand.u32 1, %s916_s14  }
  0x17   : > { %s652_s29 = sshll.u32 %s1019_s28, 3  ;;  %s671_s30 = sshll.u32 %s924_s16, 7 }
  0x18   : > { %s1222_s27 = scalar_select %p1012_p11, 1, 0 }
  0x19   : > { %s1028_s6 = scalar_lea.hbm %s1213_s0, %s671_s30  ;;  %s183_s7 = scalar_lea.vmem [#allocation2], %s652_s29 }
  0x1a   : > { %s194_s8 = sshll.u32 %s183_s7, 4  ;;  %p1036_p0 = pnand %p697_p13, %p995_p4  ;;  %s1032_s8 = int_to_ptr.vmem [resolvable:$true] %s194_s8 }
  0x1b   : > { %s180_s10 = scalar_lea.sflag [#allocation3], %s1019_s28  ;;  %s750_s11 = scalar_lea.hbm %s1028_s6, 128 }
  0x1c   : > { %p751_p3 = scmp.ne.s32.totalorder %s1028_s6, %s750_s11  ;;  %p752_p5 = pneg %p1036_p0 }
  0x1d   : > { %s755_s21 = scalar_lea.hbm %s1213_s0, 256  ;;  %p756_p4 = scmp.lt.u32.totalorder %s1028_s6, %s1213_s0 }
  0x1e   : > { %p753_p6 = pnand %p752_p5, %p751_p3  ;;  %p757_p10 = scmp.lt.u32.totalorder %s755_s21, %s750_s11 }
  0x1f   : > { %p759_p12 = scmp.lt.u32.totalorder %s750_s11, %s1028_s6 }
  0x20   : > { %p754_p7 = pneg %p753_p6  ;;  %p758_p13 = por %p757_p10, %p756_p4 }
  0x22   : > { %p760_p1 = por %p759_p12, %p758_p13 }
  0x24   : > { %p761_p2 = pnand %p760_p1, %p754_p7 }
  0x26   : > { %764 = shalt.err (!%p761_p2)
}
  0x27   : > { %s765_s4 = scalar_lea.vmem %s1032_s8, 128  ;;  %s930_s5 = smov [#allocation2]  }
  0x28   : > { %p766_p3 = scmp.ne.s32.totalorder %s1032_s8, %s765_s4  ;;  %s770_s7 = sshll.u32 %s930_s5, 4  ;;  %s771_s7 = int_to_ptr.vmem [resolvable:$false] %s770_s7 }
  0x29   : > { %s772_s18 = scalar_lea.vmem %s771_s7, 256  ;;  %p773_p9 = scmp.lt.s32.totalorder %s1032_s8, %s771_s7 }
  0x2a   : > { %p768_p6 = pnand %p766_p3, %p752_p5  ;;  %p774_p4 = scmp.lt.s32.totalorder %s772_s18, %s765_s4 }
  0x2c   : > { %p769_p11 = pneg %p768_p6  ;;  %p775_p10 = por %p774_p4, %p773_p9 }
  0x2e   : > { %p776_p12 = pnand %p775_p10, %p769_p11 }
  0x30   : > { %779 = shalt.err (!%p776_p12)
}
  0x31   : > { %686 = dma.hbm_to_vmem [thread:$0]  (!%p1036_p0), %s1028_s6, 128, %s1032_s8, %s180_s10  }
  0x32   : > { %p1224_p1 = scmp.lt.s32.totalorder %s928_s17, 3  ;;  %p1225_p2 = scmp.ge.s32.totalorder %s928_s17, 1 }
  0x33   : > { %s1081_s22 = scalar_lea.hbm %s1214_s1, %s671_s30  ;;  %s205_s23 = scalar_lea.vmem [#allocation5], %s652_s29 }
  0x34   : > { %p1072_p7 = pnand %p1225_p2, %p1224_p1  ;;  %s216_s4 = sshll.u32 %s205_s23, 4  ;;  %s217_s4 = int_to_ptr.vmem [resolvable:$true] %s216_s4 }
  0x35   : > { %s202_s6 = scalar_lea.sflag [#allocation6], %s1019_s28  ;;  %s780_s8 = scalar_lea.hbm %s1081_s22, 128 }
  0x36   : > { %s1226_s11 = scalar_select %p1072_p7, 1, 0 }
  0x37   : > { %p781_p9 = scmp.ne.s32.totalorder %s1081_s22, %s780_s8  ;;  %s785_s30 = scalar_lea.hbm %s1214_s1, 256 }
  0x38   : > { %p786_p3 = scmp.lt.u32.totalorder %s1081_s22, %s1214_s1  ;;  %p787_p6 = scmp.lt.u32.totalorder %s785_s30, %s780_s8 }
  0x39   : > { %p783_p11 = pnand %p781_p9, %p752_p5  ;;  %p789_p10 = scmp.lt.u32.totalorder %s780_s8, %s1081_s22 }
  0x3a   : > { %p788_p4 = por %p787_p6, %p786_p3 }
  0x3b   : > { %p784_p13 = pneg %p783_p11 }
  0x3c   : > { %p790_p12 = por %p789_p10, %p788_p4 }
  0x3e   : > { %p791_p1 = pnand %p790_p12, %p784_p13 }
  0x40   : > { %794 = shalt.err (!%p791_p1)
}
  0x41   : > { %s795_s28 = scalar_lea.vmem %s217_s4, 128  ;;  %s931_s29 = smov [#allocation5]  }
  0x42   : > { %p796_p2 = scmp.ne.s32.totalorder %s217_s4, %s795_s28  ;;  %s800_s19 = sshll.u32 %s931_s29, 4  ;;  %s801_s19 = int_to_ptr.vmem [resolvable:$false] %s800_s19 }
  0x43   : > { %s802_s21 = scalar_lea.vmem %s801_s19, 256  ;;  %p803_p8 = scmp.lt.s32.totalorder %s217_s4, %s801_s19 }
  0x44   : > { %p798_p9 = pnand %p796_p2, %p752_p5  ;;  %p804_p7 = scmp.lt.s32.totalorder %s802_s21, %s795_s28 }
  0x46   : > { %p799_p11 = pneg %p798_p9  ;;  %p805_p3 = por %p804_p7, %p803_p8 }
  0x48   : > { %p806_p6 = pnand %p805_p3, %p799_p11 }
  0x4a   : > { %809 = shalt.err (!%p806_p6)
}
  0x4b   : > { %689 = dma.hbm_to_vmem [thread:$0]  (!%p1036_p0), %s1081_s22, 128, %s217_s4, %s202_s6  }
  0x4c   : > { %p1227_p13 = scmp.ne.s32.totalorder %s1226_s11, 0 }
  0x4d   : > { %s1108_s23 = sand.u32 (!%p1227_p13), 1, %s912_s13   ;;  %p1228_p8 = scmp.ne.s32.totalorder (!%p1227_p13), %s1220_s24, 0 }
  0x4e   : > { %225 = sbr.rel (%p1227_p13) target bundleno = 145 (0x91), region = 28  ;;  %s1111_s8 = sshll.u32 (!%p1227_p13), %s1108_s23, 3 }
  0x4f   : > { %s228_s10 = scalar_lea.sflag (!%p1227_p13), [#allocation3], %s1108_s23  ;;  %s231_s5 = scalar_lea.vmem (!%p1227_p13), [#allocation2], %s1111_s8 }
  0x55   : > { %891 = dma.done.wait (%p1228_p8), %s228_s10, 128  }
  0x56   : > { %893 = vsyncadd (%p1228_p8), %s228_s10, 4294967168  ;;  %s237_s9 = scalar_lea.sflag [#allocation6], %s1108_s23  ;;  %s240_s11 = scalar_lea.vmem [#allocation5], %s1111_s8 }
  0x57   : > { %895 = dma.done.wait (%p1228_p8), %s237_s9, 128  }
  0x58   : > { %897 = vsyncadd (%p1228_p8), %s237_s9, 4294967168  ;;  %v293_v0 = vld [vmem:[%s231_s5] sm:$0xff]  ;;  %v300_v3 = vld [vmem:[%s240_s11] sm:$0xff]  ;;  %s673_s22 = sshll.u32 %s920_s15, 7  ;;  %s265_s4 = scalar_lea.vmem [#allocation7], %s1111_s8 }
  0x59   : > { %v294_v1 = vmul.f32 0.5, %v293_v0  ;;  %v302_v6 = vmul.f32 %v300_v3, %v300_v3  ;;  %s482_s6 = sshll.u32 %s265_s4, 4  ;;  %s272_s24 = scalar_lea.vmem [#allocation8], %s1111_s8  ;;  %s1135_s6 = int_to_ptr.vmem [resolvable:$true] %s482_s6 }
  0x5a   : > { %s498_s30 = sshll.u32 %s272_s24, 4  ;;  %s1133_s28 = scalar_lea.hbm %s1215_s2, %s673_s22  ;;  %s1142_s30 = int_to_ptr.vmem [resolvable:$true] %s498_s30 }
  0x5b   : > { %748 = vtanh.f32 %v294_v1  ;;  %s1140_s19 = scalar_lea.hbm %s1216_s3, %s673_s22  ;;  %s461_s21 = scalar_lea.sflag [#allocation4], %s1108_s23 }
  0x5c   : > { %s810_s10 = scalar_lea.vmem %s1135_s6, 128  ;;  %p1229_p5 = scmp.ne.s32.totalorder %s1221_s25, 0 }
  0x5d   : > { %p811_p0 = scmp.ne.s32.totalorder %s1135_s6, %s810_s10  ;;  %s932_s5 = smov [#allocation7]  }
  0x5e   : > { %s814_s9 = sshll.u32 %s932_s5, 4  ;;  %s815_s9 = int_to_ptr.vmem [resolvable:$false] %s814_s9 }
  0x5f   : > { %p812_p7 = pnand %p811_p0, %p1229_p5  ;;  %s816_s11 = scalar_lea.vmem %s815_s9, 256 }
  0x60   : > { %p817_p10 = scmp.lt.s32.totalorder %s1135_s6, %s815_s9  ;;  %p818_p12 = scmp.lt.s32.totalorder %s816_s11, %s810_s10 }
  0x61   : > { %p813_p4 = pneg %p812_p7 }
  0x62   : > { %p819_p1 = por %p818_p12, %p817_p10 }
  0x64   : > { %p820_p2 = pnand %p819_p1, %p813_p4 }
  0x65   : > { %v749_v2 = vpop.eup %748 }
  0x66   : > { %v296_v4 = vmul.f32 0.5, %v749_v2 }
  0x68   : > { %v297_v5 = vadd.f32 0.5, %v296_v4 }
  0x6a   : > { %v301_v7 = vmul.f32 %v300_v3, %v297_v5  ;;  %v303_v8 = vmul.f32 %v297_v5, %v297_v5 }
  0x6c   : > { %v304_v9 = vadd.f32 %v303_v8, %v302_v6  ;;  %309 = vst [vmem:[%s265_s4] sm:$0xff] %v301_v7 }
  0x6d   : > { %823 = shalt.err (!%p820_p2)
}
  0x6e   : > { %s824_s22 = scalar_lea.hbm %s1133_s28, 128  ;;  %s828_s18 = scalar_lea.hbm %s1215_s2, 256 }
  0x6f   : > { %p825_p9 = scmp.ne.s32.totalorder %s1133_s28, %s824_s22  ;;  %p829_p6 = scmp.lt.u32.totalorder %s1133_s28, %s1215_s2 }
  0x70   : > { %p830_p13 = scmp.lt.u32.totalorder %s828_s18, %s824_s22  ;;  %p832_p0 = scmp.lt.u32.totalorder %s824_s22, %s1133_s28 }
  0x71   : > { %p826_p11 = pnand %p825_p9, %p1229_p5 }
  0x72   : > { %p831_p8 = por %p830_p13, %p829_p6 }
  0x73   : > { %p827_p3 = pneg %p826_p11 }
  0x74   : > { %p833_p7 = por %p832_p0, %p831_p8 }
  0x76   : > { %p834_p4 = pnand %p833_p7, %p827_p3 }
  0x78   : > { %837 = shalt.err (!%p834_p4)
}
  0x79   : > { %679 = dma.vmem_to_hbm [thread:$0]  (%p1229_p5), %s1135_s6, 128, %s1133_s28, %s461_s21   ;;  %312 = vst [vmem:[%s272_s24] sm:$0xff] %v304_v9 }
  0x7a   : > { %s466_s10 = scalar_lea.sflag [#allocation9], %s1108_s23  ;;  %s838_s5 = scalar_lea.vmem %s1142_s30, 128 }
  0x7b   : > { %p839_p10 = scmp.ne.s32.totalorder %s1142_s30, %s838_s5  ;;  %s933_s9 = smov [#allocation8]  }
  0x7c   : > { %s842_s11 = sshll.u32 %s933_s9, 4  ;;  %s843_s11 = int_to_ptr.vmem [resolvable:$false] %s842_s11 }
  0x7d   : > { %p840_p12 = pnand %p839_p10, %p1229_p5  ;;  %s844_s22 = scalar_lea.vmem %s843_s11, 256 }
  0x7e   : > { %p845_p2 = scmp.lt.s32.totalorder %s1142_s30, %s843_s11  ;;  %p846_p9 = scmp.lt.s32.totalorder %s844_s22, %s838_s5 }
  0x7f   : > { %p841_p1 = pneg %p840_p12 }
  0x80   : > { %p847_p11 = por %p846_p9, %p845_p2 }
  0x82   : > { %p848_p3 = pnand %p847_p11, %p841_p1 }
  0x84   : > { %851 = shalt.err (!%p848_p3)
}
  0x85   : > { %s852_s23 = scalar_lea.hbm %s1140_s19, 128  ;;  %s856_s24 = scalar_lea.hbm %s1216_s3, 256 }
  0x86   : > { %p853_p6 = scmp.ne.s32.totalorder %s1140_s19, %s852_s23  ;;  %p857_p0 = scmp.lt.u32.totalorder %s1140_s19, %s1216_s3 }
  0x87   : > { %p858_p7 = scmp.lt.u32.totalorder %s856_s24, %s852_s23  ;;  %p860_p10 = scmp.lt.u32.totalorder %s852_s23, %s1140_s19 }
  0x88   : > { %p854_p13 = pnand %p853_p6, %p1229_p5 }
  0x89   : > { %p859_p4 = por %p858_p7, %p857_p0 }
  0x8a   : > { %p855_p8 = pneg %p854_p13 }
  0x8b   : > { %p861_p12 = por %p860_p10, %p859_p4 }
  0x8d   : > { %p862_p1 = pnand %p861_p12, %p855_p8 }
  0x8f   : > { %865 = shalt.err (!%p862_p1)
}
  0x90   : > { %680 = dma.vmem_to_hbm [thread:$0]  (%p1229_p5), %s1142_s30, 128, %s1140_s19, %s466_s10  }
  0x91 PF: > { %s510_s4 = sand.u32 1, %s908_s12   ;;  %p1230_p2 = scmp.ne.s32.totalorder %s1222_s27, 0 }
  0x92   : > { %p1231_p9 = scmp.ge.s32.totalorder %s928_s17, 2  ;;  %s511_s7 = scalar_lea.sflag [#allocation4], %s510_s4 }
  0x94   : > { %p691_p11 = pnand %p1231_p9, %p1230_p2 }
  0x96   : > { %899 = dma.done.wait (!%p691_p11), %s511_s7, 128  }
  0x97   : > { %901 = vsyncadd (!%p691_p11), %s511_s7, 4294967168  ;;  %s520_s18 = scalar_lea.sflag [#allocation9], %s510_s4 }
  0x98   : > { %903 = dma.done.wait (!%p691_p11), %s520_s18, 128  }
  0x99   : > { %905 = vsyncadd (!%p691_p11), %s520_s18, 4294967168  ;;  %s26_s17 = sadd.s32 1, %s928_s17   ;;  %s1232_s12 = smov %s912_s13 }
  0x9a   : > { %p23_p3 = scmp.ge.s32.totalorder %s26_s17, 4   ;;  %s1233_s13 = smov %s916_s14 }
  0x9b   : > { %s1234_s14 = smov %s1010_s26  ;;  %s1235_s15 = smov %s924_s16 }
  0x9c   : > { %s1236_s16 = smov %s1238_s20  ;;  %25 = sbr.rel (!%p23_p3) target bundleno = 10 (0xa), region = 119 }
  0xa3   :  { %525 = vsyncpa [#allocation3], 1 }
  0xa4   :  { %527 = vsyncpa [#allocation3 + $0x1], 1 }
  0xa5   :  { %528 = vsyncpa [#allocation6], 1 }
  0xa6   :  { %530 = vsyncpa [#allocation6 + $0x1], 1 }
  0xa7   :  { %531 = vsyncpa [#allocation4], 1 }
  0xa8   :  { %533 = vsyncpa [#allocation4 + $0x1], 1 }
  0xa9   :  { %534 = vsyncpa [#allocation9], 1 }
  0xaa   :  { %536 = vsyncpa [#allocation9 + $0x1], 1 }

</bundles_post_ra>
